<compile_context>
chip_gen: v7x
topology: tpu7x:2x2x1
jax: 0.10.0
libtpu: 0.0.40
codegen_flags: <defaults>
</compile_context>

<pallas_src>
import functools

import numpy as np
import jax
import jax.numpy as jnp
from jax.experimental import pallas as pl
from jax.experimental.pallas import tpu as pltpu


def _rpn_kernel(patch_ref, w_ref, b_ref, out_ref, *, n_reg):
    # patch_ref: (K1, TL)  im2col patches, lanes = flattened (batch, H, W)  (bf16)
    # w_ref:     (F, K1)   fully fused [conv o (reg ; cls-diff)] weight     (bf16)
    # b_ref:     (F, 1)    fused bias (conv bias folded through the heads)  (f32)
    # out_ref:   (F, TL)   lane-dense fused output                          (f32)
    lin = jnp.dot(w_ref[...], patch_ref[...],
                  preferred_element_type=jnp.float32) + b_ref[...]   # (F, TL)

    # Rows [0, n_reg) are the reg head (identity); rows [n_reg, F) are the
    # cls head, where sigmoid(lin) equals the pairwise softmax of the
    # original 2-way cls logits.  exp -> EUP, reciprocal(approx) -> EUP.
    sig = pl.reciprocal(1.0 + jnp.exp(-lin), approx=True)
    row = jax.lax.broadcasted_iota(jnp.int32, lin.shape, 0)
    out_ref[...] = jnp.where(row < n_reg, lin, sig).astype(out_ref.dtype)


def init_params(key, in_dim, out_dim, n_anchor):
    k1, k2, k3 = jax.random.split(key, 3)
    wc = 0.01 * jax.random.normal(k1, (3, 3, in_dim, out_dim), jnp.float32)  # HWIO
    bc = jnp.zeros((out_dim,), jnp.float32)
    wr = 0.01 * jax.random.normal(k2, (out_dim, n_anchor * 4), jnp.float32)
    br = jnp.zeros((n_anchor * 4,), jnp.float32)
    wk = 0.01 * jax.random.normal(k3, (out_dim, n_anchor * 2), jnp.float32)
    bk = jnp.zeros((n_anchor * 2,), jnp.float32)
    return wc, bc, wr, br, wk, bk


def _pick_lane_tile(total, cap=2048):
    """Largest multiple-of-128 divisor of `total` up to `cap` (else full)."""
    if total <= cap or total % 128 != 0:
        return total
    t = cap - (cap % 128)
    while t >= 128:
        if total % t == 0:
            return t
        t -= 128
    return total


def rpn_forward(x_nchw, params):
    wc, bc, wr, br, wk, bk = params
    N, Cin, H, W = x_nchw.shape
    Cout = wc.shape[3]
    A4 = wr.shape[1]
    A2 = wk.shape[1]
    A = A2 // 2
    F = A4 + A2
    P = H * W
    NP = N * P
    K1 = 9 * Cin

    # ---- im2col (wrapper-side XLA): (9*Cin, N*H*W); batch+spatial on lanes.
    # TODO(synk): for production-sized Cin, replace this 9x activation
    # expansion with a halo-aware BlockSpec over the unpadded activation.
    x_pad = jnp.pad(x_nchw, ((0, 0), (0, 0), (1, 1), (1, 1)))
    taps = [x_pad[:, :, kh:kh + H, kw:kw + W]
            for kh in range(3) for kw in range(3)]
    patches = (jnp.stack(taps, axis=0)                 # (9, N, Cin, H, W)
               .transpose(0, 2, 1, 3, 4)               # (9, Cin, N, H, W)
               .reshape(K1, NP)
               .astype(jnp.bfloat16))

    # ---- weight prep (tiny, once per call, f32 in XLA).
    wc_t = jnp.transpose(wc, (3, 0, 1, 2)).reshape(Cout, K1)      # (Cout, 9Cin)

    # cls pairwise softmax == sigmoid of the pre-differenced cls weight.
    perm = np.arange(A2) ^ 1
    wk_diff = wk - wk[:, perm]
    bk_diff = bk - bk[perm]

    # Fuse reg + cls-diff heads, then fold everything through the conv:
    #   lin = Wf @ (Wc @ patch + bc) + bh = (Wf @ Wc) @ patch + (Wf @ bc + bh)
    wf_t = jnp.concatenate([wr.T, wk_diff.T], axis=0)             # (F, Cout)
    b_head = jnp.concatenate([br, bk_diff], axis=0)               # (F,)
    w_full = (wf_t @ wc_t).astype(jnp.bfloat16)                   # (F, 9Cin)
    b_full = (wf_t @ bc + b_head).reshape(F, 1).astype(jnp.float32)

    TL = _pick_lane_tile(NP)

    cost = pl.CostEstimate(
        flops=2 * F * K1 * NP,
        transcendentals=F * NP,
        bytes_accessed=(patches.size * 2 + w_full.size * 2
                        + b_full.size * 4 + F * NP * 4),
    )

    out = pl.pallas_call(
        functools.partial(_rpn_kernel, n_reg=A4),
        out_shape=jax.ShapeDtypeStruct((F, NP), jnp.float32),
        grid=(NP // TL,),
        in_specs=[
            pl.BlockSpec((K1, TL), lambda j: (0, j)),
            pl.BlockSpec((F, K1), lambda j: (0, 0)),
            pl.BlockSpec((F, 1), lambda j: (0, 0)),
        ],
        out_specs=pl.BlockSpec((F, TL), lambda j: (0, j)),
        compiler_params=pltpu.CompilerParams(
            dimension_semantics=("parallel",)),
        cost_estimate=cost,
    )(patches, w_full, b_full)

    # Layout plumbing back to the torch views:
    # (F, N*P) -> (N, P, F) -> split reg/cls -> (N, H*W*A, 4/2).
    out = jnp.transpose(out.reshape(F, N, P), (1, 2, 0))          # (N, P, F)
    reg = out[..., :A4].reshape(N, P * A, 4)
    cls = out[..., A4:].reshape(N, P * A, 2)
    return reg, cls


def rpn_reference(x_nchw, params):
    wc, bc, wr, br, wk, bk = params
    x = jnp.transpose(x_nchw, (0, 2, 3, 1))
    feat = jax.lax.conv_general_dilated(
        x, wc, window_strides=(1, 1), padding=((1, 1), (1, 1)),
        dimension_numbers=('NHWC', 'HWIO', 'NHWC')) + bc
    reg = jnp.einsum('nhwc,cf->nhwf', feat, wr) + br
    cls = jnp.einsum('nhwc,cf->nhwf', feat, wk) + bk
    N, H, W, _ = feat.shape
    A = wk.shape[1] // 2
    reg = reg.reshape(N, H * W * A, 4)
    cls = jax.nn.softmax(cls.reshape(N, H * W * A, 2), axis=-1)
    return reg, cls


if __name__ == "__main__":
    key = jax.random.PRNGKey(0)
    kx, kp = jax.random.split(key)

    N, Cin, H, W = 2, 4, 16, 16
    out_dim, n_anchor = 32, 3

    x = jax.random.normal(kx, (N, Cin, H, W), jnp.float32)
    params = init_params(kp, Cin, out_dim, n_anchor)

    reg, cls = jax.jit(rpn_forward)(x, params)
    jax.block_until_ready((reg, cls))

    reg_ref, cls_ref = rpn_reference(x, params)
    assert reg.shape == (N, H * W * n_anchor, 4)
    assert cls.shape == (N, H * W * n_anchor, 2)
    # bf16 matmul operands (f32 accumulation) -> slightly looser tolerance.
    np.testing.assert_allclose(np.asarray(reg), np.asarray(reg_ref), atol=5e-3, rtol=5e-3)
    np.testing.assert_allclose(np.asarray(cls), np.asarray(cls_ref), atol=5e-3, rtol=5e-3)

    print("KERNEL_OK")
</pallas_src>

<mosaic_0001>
module attributes {stable_mosaic.version = 11 : i64} {
  func.func @_rpn_kernel(%arg0: i32, %arg1: memref<36x512xbf16, #tpu.memory_space<vmem>>, %arg2: memref<18x36xbf16, #tpu.memory_space<vmem>>, %arg3: memref<18x1xf32, #tpu.memory_space<vmem>>, %arg4: memref<18x512xf32, #tpu.memory_space<vmem>>) attributes {dimension_semantics = [#tpu.dimension_semantics<parallel>], iteration_bounds = array<i64: 1>, scalar_prefetch = 0 : i64, scratch_operands = 0 : i64, tpu.core_type = #tpu.core_type<tc>, window_params = [{transform_indices = @transform_0, window_bounds = array<i64: 36, 512>}, {pipeline_mode = #tpu.pipeline_mode<synchronous>, transform_indices = @transform_1, window_bounds = array<i64: 18, 36>}, {pipeline_mode = #tpu.pipeline_mode<synchronous>, transform_indices = @transform_2, window_bounds = array<i64: 18, 1>}, {transform_indices = @transform_3, window_bounds = array<i64: 18, 512>}]} {
    %c0 = arith.constant 0 : index
    %c0_0 = arith.constant 0 : index
    %0 = vector.load %arg2[%c0, %c0_0] : memref<18x36xbf16, #tpu.memory_space<vmem>>, vector<18x36xbf16>
    %c0_1 = arith.constant 0 : index
    %c0_2 = arith.constant 0 : index
    %1 = vector.load %arg1[%c0_1, %c0_2] : memref<36x512xbf16, #tpu.memory_space<vmem>>, vector<36x512xbf16>
    %cst = arith.constant dense<0.000000e+00> : vector<18x512xf32>
    %2 = tpu.matmul %0, %1, %cst {dimension_numbers = #tpu.dot_dimension_numbers<[1], [0], [0], [1], [0, 0, 1, 1], [], []>} : vector<18x36xbf16>, vector<36x512xbf16>, vector<18x512xf32> -> vector<18x512xf32>
    %c0_3 = arith.constant 0 : index
    %c0_4 = arith.constant 0 : index
    %3 = vector.load %arg3[%c0_3, %c0_4] : memref<18x1xf32, #tpu.memory_space<vmem>>, vector<18x1xf32>
    %4 = vector.broadcast %3 : vector<18x1xf32> to vector<18x512xf32>
    %5 = arith.addf %2, %4 : vector<18x512xf32>
    %cst_5 = arith.constant 0.000000e+00 : f32
    %6 = vector.broadcast %cst_5 : f32 to vector<18x512xf32>
    %7 = arith.subf %6, %5 : vector<18x512xf32>
    %8 = math.exp %7 : vector<18x512xf32>
    %cst_6 = arith.constant 1.000000e+00 : f32
    %9 = vector.broadcast %cst_6 : f32 to vector<18x512xf32>
    %10 = arith.addf %9, %8 : vector<18x512xf32>
    %11 = tpu.reciprocal %10 {approx = true} : vector<18x512xf32> -> vector<18x512xf32>
    %12 = tpu.iota {dimensions = array<i32: 0>} : vector<18x512xi32>
    %c12_i32 = arith.constant 12 : i32
    %13 = vector.broadcast %c12_i32 : i32 to vector<18x512xi32>
    %14 = arith.cmpi slt, %12, %13 : vector<18x512xi32>
    %15 = arith.select %14, %5, %11 : vector<18x512xi1>, vector<18x512xf32>
    %c0_7 = arith.constant 0 : index
    %c0_8 = arith.constant 0 : index
    %16 = vector.load %arg4[%c0_7, %c0_8] : memref<18x512xf32, #tpu.memory_space<vmem>>, vector<18x512xf32>
    tpu.vector_store %arg4[%c0_7, %c0_8], %15 {strides = array<i32>} : memref<18x512xf32, #tpu.memory_space<vmem>>, vector<18x512xf32>,
    return
  }
  func.func @transform_0(%arg0: i32) -> (i32, i32) {
    %c0_i32 = arith.constant 0 : i32
    %c0_i32_0 = arith.constant 0 : i32
    return %c0_i32, %arg0 : i32, i32
  }
  func.func @transform_1(%arg0: i32) -> (i32, i32) {
    %c0_i32 = arith.constant 0 : i32
    %c0_i32_0 = arith.constant 0 : i32
    %c0_i32_1 = arith.constant 0 : i32
    return %c0_i32, %c0_i32_0 : i32, i32
  }
  func.func @transform_2(%arg0: i32) -> (i32, i32) {
    %c0_i32 = arith.constant 0 : i32
    %c0_i32_0 = arith.constant 0 : i32
    %c0_i32_1 = arith.constant 0 : i32
    return %c0_i32, %c0_i32_0 : i32, i32
  }
  func.func @transform_3(%arg0: i32) -> (i32, i32) {
    %c0_i32 = arith.constant 0 : i32
    %c0_i32_0 = arith.constant 0 : i32
    return %c0_i32, %arg0 : i32, i32
  }
}

</mosaic_0001>

<bundles_post_ra>
// kernel: rpn_forward.1
= control target key start
LH: loop header
LB: loop body
LE: loop exit
PB: predicated region body
PF: predicated region fallthrough
CT: control target
= control target key end

     0   :  { %v394_v1 = vmov 0   ;;  %vm111_vm0 = vcmask 1041408   ;;  %vm104_vm1 = vcmask 293888   ;;  %s516_s0 = inlined_call_operand.vmem [shape: bf16[36,512], index: 0, kind: input, shape index: {}]   ;;  %s517_s2 = inlined_call_operand.vmem [shape: f32[18,1], index: 2, kind: input, shape index: {}]   ;;  %s518_s1 = inlined_call_operand.vmem [shape: bf16[18,36], index: 1, kind: input, shape index: {}]   ;;  %s519_s3 = inlined_call_operand.vmem [shape: f32[18,512], index: 3, kind: output, shape index: {}]  }
   0x1   :  { %v344_v0 = vld [vmem:[%s516_s0 + $0x4] ss:$16 sps:$4 sm:$0xff]   ;;  %156 = vmatprep.mubr.bf16.mxu0 %v394_v1  ;;  %207 = vmatprep.mubr.bf16.mxu1 %v394_v1  ;;  %v346_v2 = vld [vmem:[%s516_s0 + $0xc] ss:$16 sps:$4 sm:$0xff]   ;;  %v348_v3 = vld [vmem:[%s516_s0] ss:$16 sps:$4 sm:$0xff]  }
   0x2   :  { %343 = vset.pattern.permute.xlu1 %v394_v1  ;;  %342 = vset.pattern.permute.xlu0 %v394_v1  ;;  %v349_v4 = vld [vmem:[%s516_s0 + $0x8] ss:$16 sps:$4 sm:$0xff]   ;;  %v350_v5 = vld [vmem:[%s516_s0 + $0x24] ss:$16 sps:$4 sm:$0xff]   ;;  %v352_v6 = vld [vmem:[%s516_s0 + $0x2c] ss:$16 sps:$4 sm:$0xff]  }
   0x3   :  { %124 = vmatprep.subr.bf16.mxu0 %v344_v0  ;;  %175 = vmatprep.subr.bf16.mxu1 %v346_v2  ;;  %v354_v7 = vld [vmem:[%s516_s0 + $0x20] ss:$16 sps:$4 sm:$0xff]   ;;  %v355_v8 = vld [vmem:[%s516_s0 + $0x28] ss:$16 sps:$4 sm:$0xff]  }
   0x4   :  { %125 = vmatpush1.bf16.msra.mxu0 %v348_v3  ;;  %176 = vmatpush1.bf16.msra.mxu1 %v349_v4  ;;  %v26_v9 = vld [vmem:[%s516_s0 + $0x40] sm:$0x33]  ;;  %v27_v10 = vld [vmem:[%s516_s0 + $0x48] sm:$0x33]  ;;  %v30_v20 = vld [vmem:[%s517_s2 + $0x10] sm:$0x3] }
   0x5   :  { %126 = vmatprep.subr.bf16.mxu0 %v350_v5  ;;  %177 = vmatprep.subr.bf16.mxu1 %v352_v6  ;;  %v332_v11 = vcombine.high %v26_v9, %v26_v9  ;;  %v334_v12 = vcombine.high %v27_v10, %v27_v10  ;;  %v331_v13 = vcombine.low %v26_v9, %v26_v9  ;;  %v28_v15 = vld [vmem:[%s517_s2] sm:$0xff]  ;;  %v29_v16 = vld [vmem:[%s517_s2 + $0x8] sm:$0xff]  ;;  %v286_v5 = vlaneseq }
   0x6   :  { %v333_v14 = vcombine.low %v27_v10, %v27_v10  ;;  %33 = vperm.xlu1 %343, %v28_v15   ;;  %38 = vperm.xlu0 %342, %v29_v16   ;;  %v360_v19 = vld [vmem:[%s518_s1] sm:$0xff]   ;;  %v361_v21 = vld [vmem:[%s518_s1 + $0x8] ss:$0 sps:$4 sm:$0x11]  }
   0x7   :  { %v113_v17 = vsel %vm111_vm0, %v331_v13, 0 }
   0x8   :  { %127 = vmatpush1.bf16.msra.mxu0 %v354_v7  ;;  %178 = vmatpush1.bf16.msra.mxu1 %v355_v8  ;;  %v119_v18 = vsel %vm111_vm0, %v333_v14, 0 }
   0x9   :  { %335 = vmatprep.subr.msk.bf16.mxu0 %vm111_vm0, %v332_v11  ;;  %338 = vmatprep.subr.msk.bf16.mxu1 %vm111_vm0, %v334_v12  ;;  %v287_v12 = vshrl.u32 %v286_v5, 7 }
   0xa   :  { %43 = vperm.xlu0 %342, %v30_v20  }
   0xc   :  { %129 = vmatpush1.bf16.msra.mxu0 %v113_v17  ;;  %180 = vmatpush1.bf16.msra.mxu1 %v119_v18  ;;  %v288_v17 = vadd.s32 8, %v287_v12 }
   0xe   :  { %vm291_vm2 = vcmp.lt.s32.totalorder %v288_v17, 12 }
   0xf   :  { %336 = vmatmul.mubr.msk.bf16.vlgmr.msra.gmra.mrb[0].mxu0 %vm104_vm1, %v360_v19  ;;  %339 = vmatmul.mubr.msk.bf16.vlgmr.msra.gmra.mrb[0].mxu1 %vm104_vm1, %v360_v19 }
  0x10   :  { %166 = vmatprep.mubr.bf16.mxu0 %v394_v1  ;;  %217 = vmatprep.mubr.bf16.mxu1 %v394_v1 }
  0x17   :  { %337 = vmatmul.mubr.msk.bf16.gmra.mrb[4].mxu0 %vm104_vm1, %v361_v21  ;;  %340 = vmatmul.mubr.msk.bf16.gmra.mrb[4].mxu1 %vm104_vm1, %v361_v21 }
  0x85   :  { %v34_v22 = vpop.permute.xlu1 %33  ;;  %v39_v23 = vpop.permute.xlu0 %38 }
  0x89   :  { %v44_v46 = vpop.permute.xlu0 %43 }
  0xe2   :  { %v158_v24 = vpop.f32.mrb[0].mxu0  ;;  %v209_v25 = vpop.f32.mrb[0].mxu1 }
  0xe3   :  { %v159_v26 = vadd.f32 %v158_v24, %v34_v22  ;;  %v210_v27 = vadd.f32 %v209_v25, %v34_v22  ;;  %v160_v28 = vpop.f32.mrb[1].mxu0  ;;  %v211_v29 = vpop.f32.mrb[1].mxu1 }
  0xe4   :  { %v161_v30 = vadd.f32 %v160_v28, %v34_v22  ;;  %v212_v31 = vadd.f32 %v211_v29, %v34_v22  ;;  %v162_v32 = vpop.f32.mrb[2].mxu0  ;;  %v213_v33 = vpop.f32.mrb[2].mxu1 }
  0xe5   :  { %305 = vst [vmem:[%s519_s3] sm:$0xff] %v159_v26  ;;  %307 = vst [vmem:[%s519_s3 + $0x10] sm:$0xff] %v210_v27  ;;  %v470_v34 = vadd.f32 %v162_v32, %v39_v23  ;;  %v472_v35 = vadd.f32 %v213_v33, %v39_v23  ;;  %v164_v36 = vpop.f32.mrb[3].mxu0  ;;  %v215_v37 = vpop.f32.mrb[3].mxu1 }
  0xe6   :  { %306 = vst [vmem:[%s519_s3 + $0x8] sm:$0xff] %v161_v30  ;;  %308 = vst [vmem:[%s519_s3 + $0x18] sm:$0xff] %v212_v31  ;;  %v480_v38 = vadd.f32 %v164_v36, %v39_v23  ;;  %v482_v39 = vadd.f32 %v215_v37, %v39_v23 }
  0xe7   :  { %v230_v40 = vsub.f32 0.0, %v470_v34  ;;  %v232_v41 = vsub.f32 0.0, %v472_v35 }
  0xe8   :  { %v231_v42 = vsub.f32 0.0, %v480_v38  ;;  %v233_v43 = vsub.f32 0.0, %v482_v39 }
  0xe9   :  { %v246_v44 = vmul.f32 1.442695, %v230_v40  ;;  %v250_v45 = vmul.f32 1.442695, %v232_v41 }
  0xea   :  { %v248_v47 = vmul.f32 1.442695, %v231_v42  ;;  %v252_v48 = vmul.f32 1.442695, %v233_v43  ;;  %v168_v49 = vpop.f32.mrb[4].mxu0  ;;  %v219_v50 = vpop.f32.mrb[4].mxu1 }
  0xeb   :  { %362 = vpow2.f32 %v246_v44  ;;  %v169_v51 = vadd.f32 %v168_v49, %v44_v46  ;;  %v220_v52 = vadd.f32 %v219_v50, %v44_v46  ;;  %v170_v53 = vpop.f32.mrb[5].mxu0  ;;  %v221_v54 = vpop.f32.mrb[5].mxu1 }
  0xec   :  { %364 = vpow2.f32 %v250_v45  ;;  %v171_v55 = vadd.f32 %v170_v53, %v44_v46  ;;  %v222_v56 = vadd.f32 %v221_v54, %v44_v46  ;;  %v172_v57 = vpop.f32.mrb[6].mxu0  ;;  %v223_v58 = vpop.f32.mrb[6].mxu1 }
  0xed   :  { %366 = vpow2.f32 %v248_v47  ;;  %v234_v59 = vsub.f32 0.0, %v169_v51  ;;  %v236_v60 = vsub.f32 0.0, %v220_v52  ;;  %v173_v61 = vpop.f32.mrb[7].mxu0  ;;  %v224_v62 = vpop.f32.mrb[7].mxu1 }
  0xee   :  { %368 = vpow2.f32 %v252_v48  ;;  %v235_v63 = vsub.f32 0.0, %v171_v55  ;;  %v237_v0 = vsub.f32 0.0, %v222_v56 }
  0xef   :  { %v254_v1 = vmul.f32 1.442695, %v234_v59  ;;  %v258_v2 = vmul.f32 1.442695, %v236_v60 }
  0xf0   :  { %v256_v3 = vmul.f32 1.442695, %v235_v63  ;;  %v260_v4 = vmul.f32 1.442695, %v237_v0 }
  0xf1   :  { %370 = vpow2.f32 %v254_v1 }
  0xf2   :  { %372 = vpow2.f32 %v258_v2 }
  0xf3   :  { %374 = vpow2.f32 %v256_v3 }
  0xf4   :  { %376 = vpow2.f32 %v260_v4 }
  0xf5   :  { %v363_v6 = vpop.eup %362 }
  0xf6   :  { %v365_v7 = vpop.eup %364  ;;  %v266_v8 = vadd.f32 1.0, %v363_v6 }
  0xf7   :  { %v367_v9 = vpop.eup %366  ;;  %v268_v10 = vadd.f32 1.0, %v365_v7 }
  0xf8   :  { %v369_v11 = vpop.eup %368  ;;  %378 = vrcp.f32 %v266_v8  ;;  %v267_v13 = vadd.f32 1.0, %v367_v9 }
  0xf9   :  { %380 = vrcp.f32 %v268_v10  ;;  %v269_v14 = vadd.f32 1.0, %v369_v11 }
  0xfa   :  { %382 = vrcp.f32 %v267_v13 }
  0xfb   :  { %v371_v15 = vpop.eup %370  ;;  %384 = vrcp.f32 %v269_v14 }
  0xfc   :  { %v373_v16 = vpop.eup %372  ;;  %v270_v18 = vadd.f32 1.0, %v371_v15 }
  0xfd   :  { %v375_v19 = vpop.eup %374  ;;  %v272_v20 = vadd.f32 1.0, %v373_v16 }
  0xfe   :  { %v377_v21 = vpop.eup %376  ;;  %386 = vrcp.f32 %v270_v18  ;;  %v271_v22 = vadd.f32 1.0, %v375_v19 }
  0xff   :  { %388 = vrcp.f32 %v272_v20  ;;  %v273_v23 = vadd.f32 1.0, %v377_v21 }
 0x100   :  { %390 = vrcp.f32 %v271_v22 }
 0x101   :  { %392 = vrcp.f32 %v273_v23 }
 0x102   :  { %v379_v24 = vpop.eup %378 }
 0x103   :  { %v381_v25 = vpop.eup %380  ;;  %v297_v26 = vsel %vm291_vm2, %v470_v34, %v379_v24 }
 0x104   :  { %v383_v27 = vpop.eup %382  ;;  %309 = vst [vmem:[%s519_s3 + $0x20] sm:$0xff] %v297_v26  ;;  %v299_v28 = vsel %vm291_vm2, %v472_v35, %v381_v25 }
 0x105   :  { %v385_v29 = vpop.eup %384  ;;  %311 = vst [vmem:[%s519_s3 + $0x30] sm:$0xff] %v299_v28  ;;  %v298_v30 = vsel %vm291_vm2, %v480_v38, %v383_v27 }
 0x106   :  { %310 = vst [vmem:[%s519_s3 + $0x28] sm:$0xff] %v298_v30  ;;  %v300_v31 = vsel %vm291_vm2, %v482_v39, %v385_v29 }
 0x107   :  { %312 = vst [vmem:[%s519_s3 + $0x38] sm:$0xff] %v300_v31 }
 0x108   :  { %v387_v32 = vpop.eup %386 }
 0x109   :  { %v389_v33 = vpop.eup %388  ;;  %313 = vst [vmem:[%s519_s3 + $0x40] sm:$0x3] %v387_v32 }
 0x10a   :  { %v391_v34 = vpop.eup %390  ;;  %315 = vst [vmem:[%s519_s3 + $0x50] sm:$0x3] %v389_v33 }
 0x10b   :  { %v393_v35 = vpop.eup %392  ;;  %314 = vst [vmem:[%s519_s3 + $0x48] sm:$0x3] %v391_v34 }
 0x10c   :  { %316 = vst [vmem:[%s519_s3 + $0x58] sm:$0x3] %v393_v35 }

</bundles_post_ra>
